<compile_context>
chip_gen: v5e
topology: v5e:2x2
jax: 0.10.0
libtpu: 0.0.40
codegen_flags: <defaults>
</compile_context>

<pallas_src>
import jax
import jax.numpy as jnp
from jax.experimental import pallas as pl
from jax.experimental.pallas import tpu as pltpu

# ---- "cfg" constants ---------------------------------------------------
NUM_BONE = 8                        # cfg.PREDICTION.BODY_SCALE_UNIQUE_NUMS
NUM_COORD = 16                      # len(cfg.PREDICTION.COORDINATES)
NUM_BODY = 12                       # bodies produced by OpenSimScaleLayer
OUTPUT_SIZE = NUM_BONE + NUM_COORD + 6        # = 30
ACT_TYPE = 0                        # cfg.LAYER.OS_TRANSIT.ACT_TYPE: 0=tanh, 1=sigmoid*2-1

ROT_CH = 9                          # b1,b2,b3 (rows of the 3x3 rotation)
BODY_CH = NUM_BODY * 3              # 36
TOTAL_CH = ROT_CH + BODY_CH + NUM_COORD       # 61

_EPS_SQ = 1e-24                     # (1e-12)^2, matches F.normalize eps clamp

# TODO(synk): exact bone->body*xyz mapping comes from cfg.PREDICTION in the
# original repo (OpenSimScaleLayer); a deterministic synthetic mapping is used.
MAPPING = tuple(i % NUM_BONE for i in range(BODY_CH))


def _coalesce_runs(mapping):
    """Compress a static index mapping into (dst_start, src_start, length) runs."""
    runs = []
    i = 0
    while i < len(mapping):
        j = i
        while j + 1 < len(mapping) and mapping[j + 1] == mapping[j] + 1:
            j += 1
        runs.append((i, mapping[i], j - i + 1))
        i = j + 1
    return tuple(runs)


_BONE_RUNS = _coalesce_runs(MAPPING)


def _transition_kernel(x_ref, bsr_ref, cvr_ref, out_ref):
    x = x_ref[...]                                  # (OUTPUT_SIZE, Bt) f32

    # ---- rootRot: 6D -> 3x3 rotation (Gram-Schmidt), 9 output channels ----
    # TODO(synk): b1/b2/b3 are written as ROWS of the 3x3 block (matching the
    # previous implementation); verify against Representation6D in the repo.
    a1x = x[0:1, :]; a1y = x[1:2, :]; a1z = x[2:3, :]
    a2x = x[3:4, :]; a2y = x[4:5, :]; a2z = x[5:6, :]

    inv1 = jax.lax.rsqrt(jnp.maximum(a1x * a1x + a1y * a1y + a1z * a1z, _EPS_SQ))
    b1x = a1x * inv1; b1y = a1y * inv1; b1z = a1z * inv1

    d = b1x * a2x + b1y * a2y + b1z * a2z
    u2x = a2x - d * b1x; u2y = a2y - d * b1y; u2z = a2z - d * b1z
    inv2 = jax.lax.rsqrt(jnp.maximum(u2x * u2x + u2y * u2y + u2z * u2z, _EPS_SQ))
    b2x = u2x * inv2; b2y = u2y * inv2; b2z = u2z * inv2

    b3x = b1y * b2z - b1z * b2y
    b3y = b1z * b2x - b1x * b2z
    b3z = b1x * b2y - b1y * b2x

    out_ref[0:1, :] = b1x
    out_ref[1:2, :] = b1y
    out_ref[2:3, :] = b1z
    out_ref[3:4, :] = b2x
    out_ref[4:5, :] = b2y
    out_ref[5:6, :] = b2z
    out_ref[6:7, :] = b3x
    out_ref[7:8, :] = b3y
    out_ref[8:9, :] = b3z

    # ---- activation on the non-root channels ----
    rest = x[6:, :]                                 # (NUM_BONE + NUM_COORD, Bt)
    if ACT_TYPE == 0:
        act = jnp.tanh(rest)
    elif ACT_TYPE == 1:
        act = jnp.tanh(rest * 0.5)                  # == sigmoid(rest) * 2 - 1
    else:
        raise AssertionError("unsupported ACT_TYPE")

    # ---- predBoneScale: per-bone affine, then static bone->body*xyz copy ----
    bsr = bsr_ref[...]                              # (NUM_BONE, 2): [:,0]=offset, [:,1]=scale
    bone = act[:NUM_BONE, :] * bsr[:, 1:2] + bsr[:, 0:1]     # (NUM_BONE, Bt)
    for dst, src, n in _BONE_RUNS:                  # static, run-coalesced copies
        out_ref[ROT_CH + dst:ROT_CH + dst + n, :] = bone[src:src + n, :]

    # ---- predRot: per-coordinate affine ----
    cvr = cvr_ref[...]                              # (NUM_COORD, 2)
    out_ref[ROT_CH + BODY_CH:, :] = act[NUM_BONE:, :] * cvr[:, 1:2] + cvr[:, 0:1]


def opensim_transition(x, body_scale_range, coord_range, *, b_tile=512):
    """x: (B, OUTPUT_SIZE) f32; *_range: (N, 2) with column 0 = offset, column 1 = scale."""
    B = x.shape[0]
    assert x.shape[1] == OUTPUT_SIZE

    # feature-major layout: batch on the 128-lane axis (layout plumbing only)
    x_t = x.astype(jnp.float32).T                   # (OUTPUT_SIZE, B)
    bp = pl.cdiv(B, b_tile) * b_tile
    if bp != B:
        x_t = jnp.pad(x_t, ((0, 0), (0, bp - B)))

    out = pl.pallas_call(
        _transition_kernel,
        out_shape=jax.ShapeDtypeStruct((TOTAL_CH, bp), jnp.float32),
        grid_spec=pltpu.PrefetchScalarGridSpec(
            num_scalar_prefetch=0,
            grid=(bp // b_tile,),
            in_specs=[
                pl.BlockSpec((OUTPUT_SIZE, b_tile), lambda i: (0, i)),
                pl.BlockSpec((NUM_BONE, 2), lambda i: (0, 0)),
                pl.BlockSpec((NUM_COORD, 2), lambda i: (0, 0)),
            ],
            out_specs=pl.BlockSpec((TOTAL_CH, b_tile), lambda i: (0, i)),
        ),
        compiler_params=pltpu.CompilerParams(
            dimension_semantics=("parallel",)),
    )(x_t, body_scale_range.astype(jnp.float32), coord_range.astype(jnp.float32))

    out = out[:, :B]
    rot3 = out[:ROT_CH, :].T.reshape(B, 3, 3)
    root = (jnp.zeros((B, 4, 4), jnp.float32)
            .at[:, :3, :3].set(rot3)
            .at[:, 3, 3].set(1.0))
    bone_scale = out[ROT_CH:ROT_CH + BODY_CH, :].T.reshape(B, NUM_BODY, 3)
    pred_rot = out[ROT_CH + BODY_CH:, :].T
    return {"predBoneScale": bone_scale, "predRot": pred_rot, "rootRot": root}


def _reference(x, bsr, cvr):
    """Pure-JAX reference of the same forward pass (for correctness check)."""
    B = x.shape[0]
    a1, a2 = x[:, 0:3], x[:, 3:6]
    inv1 = jax.lax.rsqrt(jnp.maximum(jnp.sum(a1 * a1, -1, keepdims=True), _EPS_SQ))
    b1 = a1 * inv1
    d = jnp.sum(b1 * a2, -1, keepdims=True)
    u2 = a2 - d * b1
    inv2 = jax.lax.rsqrt(jnp.maximum(jnp.sum(u2 * u2, -1, keepdims=True), _EPS_SQ))
    b2 = u2 * inv2
    b3 = jnp.cross(b1, b2)
    rot3 = jnp.stack([b1, b2, b3], axis=1)
    root = (jnp.zeros((B, 4, 4), jnp.float32)
            .at[:, :3, :3].set(rot3)
            .at[:, 3, 3].set(1.0))
    act = jnp.tanh(x[:, 6:]) if ACT_TYPE == 0 else jnp.tanh(x[:, 6:] * 0.5)
    bone_u = act[:, :NUM_BONE] * bsr[None, :, 1] + bsr[None, :, 0]
    bone = bone_u[:, jnp.asarray(MAPPING)].reshape(B, NUM_BODY, 3)
    prot = act[:, NUM_BONE:] * cvr[None, :, 1] + cvr[None, :, 0]
    return {"predBoneScale": bone, "predRot": prot, "rootRot": root}


if __name__ == "__main__":
    key = jax.random.PRNGKey(0)
    kx, kb, kc = jax.random.split(key, 3)

    B = 256                                          # multiple of 128 -> lane-dense
    x = jax.random.normal(kx, (B, OUTPUT_SIZE), dtype=jnp.float32)

    # (N, 2) value ranges, as stored by the PyTorch module: [:,0]=offset, [:,1]=scale
    body_scale_range = jnp.stack(
        [0.1 * jax.random.normal(kb, (NUM_BONE,), dtype=jnp.float32),
         0.5 + 0.1 * jnp.arange(NUM_BONE, dtype=jnp.float32)], axis=1)
    coord_range = jnp.stack(
        [0.1 * jax.random.normal(kc, (NUM_COORD,), dtype=jnp.float32),
         1.0 + 0.05 * jnp.arange(NUM_COORD, dtype=jnp.float32)], axis=1)

    out = opensim_transition(x, body_scale_range, coord_range, b_tile=128)
    jax.block_until_ready(out)

    assert out["rootRot"].shape == (B, 4, 4)
    assert out["predBoneScale"].shape == (B, NUM_BODY, 3)
    assert out["predRot"].shape == (B, NUM_COORD)

    ref = _reference(x, body_scale_range, coord_range)
    for k in ("rootRot", "predBoneScale", "predRot"):
        assert bool(jnp.allclose(out[k], ref[k], atol=1e-4, rtol=1e-4)), k

    print("KERNEL_OK")
</pallas_src>

<mosaic_0001>
module attributes {stable_mosaic.version = 11 : i64} {
  func.func @_transition_kernel(%arg0: i32, %arg1: memref<30x128xf32, #tpu.memory_space<vmem>>, %arg2: memref<8x2xf32, #tpu.memory_space<vmem>>, %arg3: memref<16x2xf32, #tpu.memory_space<vmem>>, %arg4: memref<61x128xf32, #tpu.memory_space<vmem>>) attributes {dimension_semantics = [#tpu.dimension_semantics<parallel>], iteration_bounds = array<i64: 2>, scalar_prefetch = 0 : i64, scratch_operands = 0 : i64, tpu.core_type = #tpu.core_type<tc>, window_params = [{transform_indices = @transform_0, window_bounds = array<i64: 30, 128>}, {pipeline_mode = #tpu.pipeline_mode<synchronous>, transform_indices = @transform_1, window_bounds = array<i64: 8, 2>}, {pipeline_mode = #tpu.pipeline_mode<synchronous>, transform_indices = @transform_2, window_bounds = array<i64: 16, 2>}, {transform_indices = @transform_3, window_bounds = array<i64: 61, 128>}]} {
    %c0 = arith.constant 0 : index
    %c0_0 = arith.constant 0 : index
    %0 = vector.load %arg1[%c0, %c0_0] : memref<30x128xf32, #tpu.memory_space<vmem>>, vector<30x128xf32>
    %1 = vector.extract_strided_slice %0 {offsets = [0, 0], sizes = [1, 128], strides = [1, 1]} : vector<30x128xf32> to vector<1x128xf32>
    %2 = vector.extract_strided_slice %0 {offsets = [1, 0], sizes = [1, 128], strides = [1, 1]} : vector<30x128xf32> to vector<1x128xf32>
    %3 = vector.extract_strided_slice %0 {offsets = [2, 0], sizes = [1, 128], strides = [1, 1]} : vector<30x128xf32> to vector<1x128xf32>
    %4 = vector.extract_strided_slice %0 {offsets = [3, 0], sizes = [1, 128], strides = [1, 1]} : vector<30x128xf32> to vector<1x128xf32>
    %5 = vector.extract_strided_slice %0 {offsets = [4, 0], sizes = [1, 128], strides = [1, 1]} : vector<30x128xf32> to vector<1x128xf32>
    %6 = vector.extract_strided_slice %0 {offsets = [5, 0], sizes = [1, 128], strides = [1, 1]} : vector<30x128xf32> to vector<1x128xf32>
    %7 = arith.mulf %1, %1 : vector<1x128xf32>
    %8 = arith.mulf %2, %2 : vector<1x128xf32>
    %9 = arith.addf %7, %8 : vector<1x128xf32>
    %10 = arith.mulf %3, %3 : vector<1x128xf32>
    %11 = arith.addf %9, %10 : vector<1x128xf32>
    %cst = arith.constant 1.000000e-24 : f32
    %12 = vector.broadcast %cst : f32 to vector<1x128xf32>
    %13 = arith.maximumf %11, %12 : vector<1x128xf32>
    %14 = math.rsqrt %13 : vector<1x128xf32>
    %15 = arith.mulf %1, %14 : vector<1x128xf32>
    %16 = arith.mulf %2, %14 : vector<1x128xf32>
    %17 = arith.mulf %3, %14 : vector<1x128xf32>
    %18 = arith.mulf %15, %4 : vector<1x128xf32>
    %19 = arith.mulf %16, %5 : vector<1x128xf32>
    %20 = arith.addf %18, %19 : vector<1x128xf32>
    %21 = arith.mulf %17, %6 : vector<1x128xf32>
    %22 = arith.addf %20, %21 : vector<1x128xf32>
    %23 = arith.mulf %22, %15 : vector<1x128xf32>
    %24 = arith.subf %4, %23 : vector<1x128xf32>
    %25 = arith.mulf %22, %16 : vector<1x128xf32>
    %26 = arith.subf %5, %25 : vector<1x128xf32>
    %27 = arith.mulf %22, %17 : vector<1x128xf32>
    %28 = arith.subf %6, %27 : vector<1x128xf32>
    %29 = arith.mulf %24, %24 : vector<1x128xf32>
    %30 = arith.mulf %26, %26 : vector<1x128xf32>
    %31 = arith.addf %29, %30 : vector<1x128xf32>
    %32 = arith.mulf %28, %28 : vector<1x128xf32>
    %33 = arith.addf %31, %32 : vector<1x128xf32>
    %cst_1 = arith.constant 1.000000e-24 : f32
    %34 = vector.broadcast %cst_1 : f32 to vector<1x128xf32>
    %35 = arith.maximumf %33, %34 : vector<1x128xf32>
    %36 = math.rsqrt %35 : vector<1x128xf32>
    %37 = arith.mulf %24, %36 : vector<1x128xf32>
    %38 = arith.mulf %26, %36 : vector<1x128xf32>
    %39 = arith.mulf %28, %36 : vector<1x128xf32>
    %40 = arith.mulf %16, %39 : vector<1x128xf32>
    %41 = arith.mulf %17, %38 : vector<1x128xf32>
    %42 = arith.subf %40, %41 : vector<1x128xf32>
    %43 = arith.mulf %17, %37 : vector<1x128xf32>
    %44 = arith.mulf %15, %39 : vector<1x128xf32>
    %45 = arith.subf %43, %44 : vector<1x128xf32>
    %46 = arith.mulf %15, %38 : vector<1x128xf32>
    %47 = arith.mulf %16, %37 : vector<1x128xf32>
    %48 = arith.subf %46, %47 : vector<1x128xf32>
    %c0_2 = arith.constant 0 : index
    %c0_3 = arith.constant 0 : index
    %49 = vector.load %arg4[%c0_2, %c0_3] : memref<61x128xf32, #tpu.memory_space<vmem>>, vector<1x128xf32>
    tpu.vector_store %arg4[%c0_2, %c0_3], %15 {strides = array<i32>} : memref<61x128xf32, #tpu.memory_space<vmem>>, vector<1x128xf32>,
    %c1 = arith.constant 1 : index
    %c0_4 = arith.constant 0 : index
    %50 = vector.load %arg4[%c1, %c0_4] : memref<61x128xf32, #tpu.memory_space<vmem>>, vector<1x128xf32>
    tpu.vector_store %arg4[%c1, %c0_4], %16 {strides = array<i32>} : memref<61x128xf32, #tpu.memory_space<vmem>>, vector<1x128xf32>,
    %c2 = arith.constant 2 : index
    %c0_5 = arith.constant 0 : index
    %51 = vector.load %arg4[%c2, %c0_5] : memref<61x128xf32, #tpu.memory_space<vmem>>, vector<1x128xf32>
    tpu.vector_store %arg4[%c2, %c0_5], %17 {strides = array<i32>} : memref<61x128xf32, #tpu.memory_space<vmem>>, vector<1x128xf32>,
    %c3 = arith.constant 3 : index
    %c0_6 = arith.constant 0 : index
    %52 = vector.load %arg4[%c3, %c0_6] : memref<61x128xf32, #tpu.memory_space<vmem>>, vector<1x128xf32>
    tpu.vector_store %arg4[%c3, %c0_6], %37 {strides = array<i32>} : memref<61x128xf32, #tpu.memory_space<vmem>>, vector<1x128xf32>,
    %c4 = arith.constant 4 : index
    %c0_7 = arith.constant 0 : index
    %53 = vector.load %arg4[%c4, %c0_7] : memref<61x128xf32, #tpu.memory_space<vmem>>, vector<1x128xf32>
    tpu.vector_store %arg4[%c4, %c0_7], %38 {strides = array<i32>} : memref<61x128xf32, #tpu.memory_space<vmem>>, vector<1x128xf32>,
    %c5 = arith.constant 5 : index
    %c0_8 = arith.constant 0 : index
    %54 = vector.load %arg4[%c5, %c0_8] : memref<61x128xf32, #tpu.memory_space<vmem>>, vector<1x128xf32>
    tpu.vector_store %arg4[%c5, %c0_8], %39 {strides = array<i32>} : memref<61x128xf32, #tpu.memory_space<vmem>>, vector<1x128xf32>,
    %c6 = arith.constant 6 : index
    %c0_9 = arith.constant 0 : index
    %55 = vector.load %arg4[%c6, %c0_9] : memref<61x128xf32, #tpu.memory_space<vmem>>, vector<1x128xf32>
    tpu.vector_store %arg4[%c6, %c0_9], %42 {strides = array<i32>} : memref<61x128xf32, #tpu.memory_space<vmem>>, vector<1x128xf32>,
    %c7 = arith.constant 7 : index
    %c0_10 = arith.constant 0 : index
    %56 = vector.load %arg4[%c7, %c0_10] : memref<61x128xf32, #tpu.memory_space<vmem>>, vector<1x128xf32>
    tpu.vector_store %arg4[%c7, %c0_10], %45 {strides = array<i32>} : memref<61x128xf32, #tpu.memory_space<vmem>>, vector<1x128xf32>,
    %c8 = arith.constant 8 : index
    %c0_11 = arith.constant 0 : index
    %57 = vector.load %arg4[%c8, %c0_11] : memref<61x128xf32, #tpu.memory_space<vmem>>, vector<1x128xf32>
    tpu.vector_store %arg4[%c8, %c0_11], %48 {strides = array<i32>} : memref<61x128xf32, #tpu.memory_space<vmem>>, vector<1x128xf32>,
    %58 = vector.extract_strided_slice %0 {offsets = [6, 0], sizes = [24, 128], strides = [1, 1]} : vector<30x128xf32> to vector<24x128xf32>
    %59 = math.tanh %58 : vector<24x128xf32>
    %c0_12 = arith.constant 0 : index
    %c0_13 = arith.constant 0 : index
    %60 = vector.load %arg2[%c0_12, %c0_13] : memref<8x2xf32, #tpu.memory_space<vmem>>, vector<8x2xf32>
    %61 = vector.extract_strided_slice %59 {offsets = [0, 0], sizes = [8, 128], strides = [1, 1]} : vector<24x128xf32> to vector<8x128xf32>
    %62 = vector.extract_strided_slice %60 {offsets = [0, 1], sizes = [8, 1], strides = [1, 1]} : vector<8x2xf32> to vector<8x1xf32>
    %63 = vector.broadcast %62 : vector<8x1xf32> to vector<8x128xf32>
    %64 = arith.mulf %61, %63 : vector<8x128xf32>
    %65 = vector.extract_strided_slice %60 {offsets = [0, 0], sizes = [8, 1], strides = [1, 1]} : vector<8x2xf32> to vector<8x1xf32>
    %66 = vector.broadcast %65 : vector<8x1xf32> to vector<8x128xf32>
    %67 = arith.addf %64, %66 : vector<8x128xf32>
    %c9 = arith.constant 9 : index
    %c0_14 = arith.constant 0 : index
    %68 = vector.load %arg4[%c9, %c0_14] : memref<61x128xf32, #tpu.memory_space<vmem>>, vector<8x128xf32>
    tpu.vector_store %arg4[%c9, %c0_14], %67 {strides = array<i32>} : memref<61x128xf32, #tpu.memory_space<vmem>>, vector<8x128xf32>,
    %c17 = arith.constant 17 : index
    %c0_15 = arith.constant 0 : index
    %69 = vector.load %arg4[%c17, %c0_15] : memref<61x128xf32, #tpu.memory_space<vmem>>, vector<8x128xf32>
    tpu.vector_store %arg4[%c17, %c0_15], %67 {strides = array<i32>} : memref<61x128xf32, #tpu.memory_space<vmem>>, vector<8x128xf32>,
    %c25 = arith.constant 25 : index
    %c0_16 = arith.constant 0 : index
    %70 = vector.load %arg4[%c25, %c0_16] : memref<61x128xf32, #tpu.memory_space<vmem>>, vector<8x128xf32>
    tpu.vector_store %arg4[%c25, %c0_16], %67 {strides = array<i32>} : memref<61x128xf32, #tpu.memory_space<vmem>>, vector<8x128xf32>,
    %c33 = arith.constant 33 : index
    %c0_17 = arith.constant 0 : index
    %71 = vector.load %arg4[%c33, %c0_17] : memref<61x128xf32, #tpu.memory_space<vmem>>, vector<8x128xf32>
    tpu.vector_store %arg4[%c33, %c0_17], %67 {strides = array<i32>} : memref<61x128xf32, #tpu.memory_space<vmem>>, vector<8x128xf32>,
    %72 = vector.extract_strided_slice %67 {offsets = [0, 0], sizes = [4, 128], strides = [1, 1]} : vector<8x128xf32> to vector<4x128xf32>
    %c41 = arith.constant 41 : index
    %c0_18 = arith.constant 0 : index
    %73 = vector.load %arg4[%c41, %c0_18] : memref<61x128xf32, #tpu.memory_space<vmem>>, vector<4x128xf32>
    tpu.vector_store %arg4[%c41, %c0_18], %72 {strides = array<i32>} : memref<61x128xf32, #tpu.memory_space<vmem>>, vector<4x128xf32>,
    %c0_19 = arith.constant 0 : index
    %c0_20 = arith.constant 0 : index
    %74 = vector.load %arg3[%c0_19, %c0_20] : memref<16x2xf32, #tpu.memory_space<vmem>>, vector<16x2xf32>
    %75 = vector.extract_strided_slice %59 {offsets = [8, 0], sizes = [16, 128], strides = [1, 1]} : vector<24x128xf32> to vector<16x128xf32>
    %76 = vector.extract_strided_slice %74 {offsets = [0, 1], sizes = [16, 1], strides = [1, 1]} : vector<16x2xf32> to vector<16x1xf32>
    %77 = vector.broadcast %76 : vector<16x1xf32> to vector<16x128xf32>
    %78 = arith.mulf %75, %77 : vector<16x128xf32>
    %79 = vector.extract_strided_slice %74 {offsets = [0, 0], sizes = [16, 1], strides = [1, 1]} : vector<16x2xf32> to vector<16x1xf32>
    %80 = vector.broadcast %79 : vector<16x1xf32> to vector<16x128xf32>
    %81 = arith.addf %78, %80 : vector<16x128xf32>
    %c45 = arith.constant 45 : index
    %c0_21 = arith.constant 0 : index
    %82 = vector.load %arg4[%c45, %c0_21] : memref<61x128xf32, #tpu.memory_space<vmem>>, vector<16x128xf32>
    tpu.vector_store %arg4[%c45, %c0_21], %81 {strides = array<i32>} : memref<61x128xf32, #tpu.memory_space<vmem>>, vector<16x128xf32>,
    return
  }
  func.func @transform_0(%arg0: i32) -> (i32, i32) {
    %c0_i32 = arith.constant 0 : i32
    %c0_i32_0 = arith.constant 0 : i32
    return %c0_i32, %arg0 : i32, i32
  }
  func.func @transform_1(%arg0: i32) -> (i32, i32) {
    %c0_i32 = arith.constant 0 : i32
    %c0_i32_0 = arith.constant 0 : i32
    %c0_i32_1 = arith.constant 0 : i32
    return %c0_i32, %c0_i32_0 : i32, i32
  }
  func.func @transform_2(%arg0: i32) -> (i32, i32) {
    %c0_i32 = arith.constant 0 : i32
    %c0_i32_0 = arith.constant 0 : i32
    %c0_i32_1 = arith.constant 0 : i32
    return %c0_i32, %c0_i32_0 : i32, i32
  }
  func.func @transform_3(%arg0: i32) -> (i32, i32) {
    %c0_i32 = arith.constant 0 : i32
    %c0_i32_0 = arith.constant 0 : i32
    return %c0_i32, %arg0 : i32, i32
  }
}

</mosaic_0001>

<bundles_post_ra>
// kernel: tpu_custom_call.1
= control target key start
LH: loop header
LB: loop body
LE: loop exit
PB: predicated region body
PF: predicated region fallthrough
CT: control target
= control target key end

     0   :  { %8 = vsyncpa [#allocation3], 0  ;;  %s873_s0 = inlined_call_operand.hbm [shape: f32[30,256], index: 0, kind: input, shape index: {}]   ;;  %s874_s1 = inlined_call_operand.vmem [shape: f32[8,2], index: 1, kind: input, shape index: {}]   ;;  %s875_s2 = inlined_call_operand.vmem [shape: f32[16,2], index: 2, kind: input, shape index: {}]   ;;  %s876_s3 = inlined_call_operand.hbm [shape: f32[61,256], index: 3, kind: output, shape index: {}]  }
   0x1   :  { %10 = vsyncpa [#allocation3 + $0x1], 0 }
   0x2   :  { %11 = vsyncpa [#allocation4], 0 }
   0x3   :  { %13 = vsyncpa [#allocation4 + $0x1], 0  ;;  %s693_s12 = smov 0   ;;  %s695_s13 = smov 0  }
   0x4   :  { %s697_s14 = smov 0   ;;  %s699_s15 = smov 0  }
   0x5 LB: > { %s714_s16 = sadd.s32 4294967295, %s663_s15   ;;  %s484_s17 = sadd.s32 4294967294, %s663_s15   ;;  %s663_s15 = sphi %s699_s15, %s885_s15   ;;  %s659_s14 = sphi %s697_s14, %s884_s14   ;;  %s655_s13 = sphi %s695_s13, %s883_s13   ;;  %s651_s12 = sphi %s693_s12, %s882_s12  }
   0x6   : > { %s718_s18 = sadd.s32 1, %s663_s15   ;;  %s26_s19 = sadd.s32 1, %s659_s14 }
   0x7   : > { %s23_s20 = ssub.s32 %s663_s15, %s718_s18  ;;  %p33_p0 = scmp.ne.s32.totalorder %s659_s14, %s655_s13 }
   0x8   : > { %p24_p1 = scmp.eq.s32.totalorder %s23_s20, 0  ;;  %p34_p2 = scmp.eq.s32.totalorder %s663_s15, 0 }
   0x9   : > { %p39_p3 = scmp.ne.s32.totalorder %s655_s13, %s651_s12  ;;  %p40_p4 = scmp.eq.s32.totalorder %s714_s16, 0 }
   0xa   : > { %s730_s21 = scalar_select %p24_p1, %s659_s14, %s26_s19  }
   0xb   : > { %p732_p5 = por %p34_p2, %p33_p0  ;;  %p736_p6 = por %p40_p4, %p39_p3 }
   0xc   : > { %p105_p7 = scmp.eq.s32.totalorder %s714_s16, 1  ;;  %p111_p8 = scmp.eq.s32.totalorder %s484_s17, 1 }
   0xd   : > { %p486_p9 = scmp.ge.s32.totalorder %s663_s15, 2  ;;  %p508_p10 = scmp.lt.s32.totalorder %s663_s15, 2 }
   0xe   : > { %p743_p11 = por %p105_p7, %p33_p0  ;;  %p747_p12 = por %p111_p8, %p39_p3 }
   0xf   : > { %s137_s26 = sand.u32 1, %s659_s14   ;;  %s488_s27 = sshll.u32 %s663_s15, 3 }
  0x10   : > { %s487_s28 = sshll.u32 %s137_s26, 5  ;;  %s145_s4 = scalar_lea.hbm %s873_s0, %s488_s27 }
  0x11   : > { %s146_s5 = sshll.u32 %s145_s4, 4  ;;  %s141_s6 = scalar_lea.vmem [#allocation2], %s487_s28  ;;  %s147_s5 = int_to_ptr.hbm [resolvable:$true] %s146_s5 }
  0x12   : > { %s148_s7 = sshll.u32 %s141_s6, 4  ;;  %p758_p13 = pnand %p508_p10, %p732_p5  ;;  %s149_s7 = int_to_ptr.vmem [resolvable:$true] %s148_s7 }
  0x13   : > { %p489_p0 = scmp.ge.s32.totalorder %s663_s15, 1  ;;  %s138_s9 = scalar_lea.sflag [#allocation3], %s137_s26 }
  0x14   : > { %s567_s10 = sshra.s32 %s147_s5, 4  ;;  %p571_p2 = pneg %p758_p13  ;;  %s568_s10 = int_to_ptr.hbm [resolvable:$true] %s567_s10 }
  0x15   : > { %s569_s11 = scalar_lea.hbm %s568_s10, 32  ;;  %s574_s20 = scalar_lea.hbm %s873_s0, 64 }
  0x16   : > { %p570_p1 = scmp.ne.s32.totalorder %s568_s10, %s569_s11  ;;  %p575_p5 = scmp.lt.s32.totalorder %s568_s10, %s873_s0 }
  0x17   : > { %p576_p7 = scmp.lt.s32.totalorder %s574_s20, %s569_s11 }
  0x18   : > { %p572_p3 = pnand %p571_p2, %p570_p1 }
  0x19   : > { %p577_p8 = por %p576_p7, %p575_p5 }
  0x1a   : > { %p573_p4 = pneg %p572_p3 }
  0x1c   : > { %p578_p10 = pnand %p577_p8, %p573_p4 }
  0x1e   : > { %581 = shalt.err (!%p578_p10)
}
  0x1f   : > { %s665_s26 = smov 256   ;;  %s666_s28 = smov 128  }
  0x20   : > { %s667_s29 = smov 8   ;;  %p156_p1 = scmp.lt.s32.totalorder %s663_s15, 3 }
  0x21   : > { %503 = dma.hbm_to_vmem [thread:$0]  (!%p758_p13), %s147_s5, 512, %s149_s7, %s138_s9, %s665_s26, %s666_s28, %s667_s29  }
  0x22   : > { %p157_p2 = pnand %p489_p0, %p156_p1 }
  0x23   : > { %s777_s30 = sand.u32 (!%p157_p2), 1, %s655_s13  }
  0x24   : > { %160 = sbr.rel (%p157_p2) target bundleno = 183 (0xb7), region = 32  ;;  %s490_s4 = sshll.u32 (!%p157_p2), %s777_s30, 5 }
  0x25   : > { %s163_s6 = scalar_lea.sflag (!%p157_p2), [#allocation3], %s777_s30  ;;  %s781_s10 = scalar_lea.vmem (!%p157_p2), [#allocation2], %s490_s4 }
  0x29   : > { %642 = dma.done.wait (%p736_p6), %s163_s6, 512  }
  0x2a   : > { %644 = vsyncadd (%p736_p6), %s163_s6, 4294966784  ;;  %v668_v0 = vmov 1   ;;  %v669_v1 = vmov 0   ;;  %v358_v2 = vld [vmem:[%s875_s2] sm:$0xff]  ;;  %v359_v4 = vld [vmem:[%s875_s2 + $0x8] sm:$0xff]  ;;  %s491_s23 = sshll.u32 %s777_s30, 6 }
  0x2b   : > { %551 = vset.pattern.permute.xlu1 %v668_v0  ;;  %550 = vset.pattern.permute.xlu0 %v668_v0  ;;  %v332_v3 = vld [vmem:[%s874_s1] sm:$0xff]  ;;  %s806_s19 = scalar_lea.vmem [#allocation5], %s491_s23  ;;  %s493_s20 = sshll.u32 %s714_s16, 3  ;;  %vm368_vm6 = vcmask 1045504  }
  0x2c   : > { %553 = vset.pattern.permute.xlu2 %v669_v1  ;;  %362 = vperm.xlu0 %550, %v358_v2   ;;  %v797_v5 = vld [vmem:[%s781_s10] sm:$0xff]  ;;  %s407_s16 = scalar_lea.hbm %s876_s3, %s493_s20  ;;  %s408_s26 = sshll.u32 %s806_s19, 4  ;;  %s409_s26 = int_to_ptr.vmem [resolvable:$true] %s408_s26 }
  0x2d   : > { %335 = vperm.xlu1 %551, %v332_v3   ;;  %382 = vperm.xlu2 %553, %v359_v4   ;;  %v194_v6 = vmul.f32 %v797_v5, %v797_v5  ;;  %v222_v22 = vrot.slane %v797_v5, 3  ;;  %s410_s28 = sshll.u32 %s407_s16, 4  ;;  %s397_s29 = scalar_lea.sflag [#allocation4], %s777_s30  ;;  %s411_s28 = int_to_ptr.hbm [resolvable:$true] %s410_s28 }
  0x2e   : > { %s611_s4 = sshra.s32 %s411_s28, 4  ;;  %s617_s7 = scalar_lea.hbm %s876_s3, 128  ;;  %s612_s4 = int_to_ptr.hbm [resolvable:$true] %s611_s4 }
  0x2f   : > { %v196_v7 = vrot.slane %v194_v6, 1  ;;  %v199_v9 = vrot.slane %v194_v6, 2  ;;  %s613_s6 = scalar_lea.hbm %s612_s4, 64  ;;  %p618_p3 = scmp.lt.s32.totalorder %s612_s4, %s876_s3 }
  0x30   : > { %p614_p6 = scmp.ne.s32.totalorder %s612_s4, %s613_s6  ;;  %p619_p4 = scmp.lt.s32.totalorder %s617_s7, %s613_s6 }
  0x31   : > { %v198_v8 = vadd.f32 %v196_v7, %v194_v6 }
  0x32   : > { %p615_p13 = pnand %p614_p6, %p743_p11  ;;  %p620_p5 = por %p619_p4, %p618_p3 }
  0x33   : > { %v201_v10 = vadd.f32 %v199_v9, %v198_v8 }
  0x34   : > { %366 = vperm.xlu0 %550, %v359_v4   ;;  %p616_p0 = pneg %p615_p13 }
  0x35   : > { %552 = vset.pattern.permute.xlu1 %v669_v1  ;;  %342 = vperm.xlu2 %553, %v332_v3   ;;  %v202_v11 = vmax.f32 %v201_v10, 1e-24 }
  0x36   : > { %379 = vperm.xlu1 %552, %v358_v2   ;;  %p621_p7 = pnand %p620_p5, %p616_p0 }
  0x37   : > { %555 = vrsqrt.f32 %v202_v11  ;;  %vm209_vm0 = vweird.f32 %v202_v11 }
  0x3c   : > { %554 = vset.pattern.permute.xlu0 %v669_v1 }
  0x3d   : > { %v556_v12 = vpop.eup %555 }
  0x3e   : > { %v204_v13 = vmul.f32 %v556_v12, %v202_v11  ;;  %vm210_vm1 = vweird.f32 %v556_v12 }
  0x3f   : > { %vm211_vm2 = vmor %vm209_vm0, %vm210_vm1 }
  0x40   : > { %v205_v14 = vmul.f32 %v556_v12, %v204_v13 }
  0x42   : > { %v206_v15 = vmul.f32 0.5, %v205_v14 }
  0x44   : > { %v207_v16 = vsub.f32 1.5, %v206_v15 }
  0x46   : > { %v208_v17 = vmul.f32 %v556_v12, %v207_v16 }
  0x48   : > { %v212_v18 = vsel %vm211_vm2, %v556_v12, %v208_v17 }
  0x49   : > { %v215_v19 = vrot.slane %v212_v18, 7  ;;  %v218_v21 = vrot.slane %v212_v18, 6  ;;  %v213_v23 = vmul.f32 %v212_v18, %v797_v5 }
  0x4b   : > { %v217_v20 = vmul.f32 %v215_v19, %v797_v5  ;;  %v220_v24 = vmul.f32 %v218_v21, %v797_v5  ;;  %v224_v26 = vmul.f32 %v222_v22, %v213_v23  ;;  %319 = vst [vmem:[%s806_s19] sm:$0x1] %v213_v23  ;;  %v191_v19 = vld [vmem:[%s781_s10 + $0x8] sm:$0xff] }
  0x4d   : > { %v225_v25 = vmul.f32 %v222_v22, %v217_v20  ;;  %320 = vst [vmem:[%s806_s19] sm:$0x2] %v217_v20  ;;  %v230_v28 = vmul.f32 %v222_v22, %v220_v24  ;;  %v241_v32 = vrot.slane %v217_v20, 1  ;;  %v249_v34 = vrot.slane %v220_v24, 2  ;;  %v193_v22 = vld [vmem:[%s781_s10 + $0x18] sm:$0x3f] }
  0x4e   : > { %321 = vst [vmem:[%s806_s19] sm:$0x4] %v220_v24 }
  0x4f   : > { %v227_v27 = vrot.slane %v225_v25, 1  ;;  %v232_v30 = vrot.slane %v230_v28, 2 }
  0x51   : > { %v229_v29 = vadd.f32 %v227_v27, %v224_v26  ;;  %v192_v26 = vld [vmem:[%s781_s10 + $0x10] sm:$0xff] }
  0x53   : > { %v234_v31 = vadd.f32 %v232_v30, %v229_v29 }
  0x55   : > { %v243_v33 = vmul.f32 %v241_v32, %v234_v31  ;;  %v235_v35 = vmul.f32 %v234_v31, %v213_v23  ;;  %v251_v37 = vmul.f32 %v249_v34, %v234_v31 }
  0x57   : > { %v245_v36 = vrot.slane %v243_v33, 4  ;;  %v237_v38 = vrot.slane %v235_v35, 5  ;;  %v253_v40 = vrot.slane %v251_v37, 3 }
  0x59   : > { %v247_v39 = vsub.f32 %v797_v5, %v245_v36  ;;  %v239_v41 = vsub.f32 %v797_v5, %v237_v38  ;;  %v255_v42 = vsub.f32 %v797_v5, %v253_v40 }
  0x5b   : > { %v257_v43 = vmul.f32 %v247_v39, %v247_v39  ;;  %v256_v44 = vmul.f32 %v239_v41, %v239_v41  ;;  %v262_v46 = vmul.f32 %v255_v42, %v255_v42 }
  0x5d   : > { %v259_v45 = vrot.slane %v257_v43, 1  ;;  %v264_v48 = vrot.slane %v262_v46, 2 }
  0x5f   : > { %v261_v47 = vadd.f32 %v259_v45, %v256_v44 }
  0x61   : > { %v266_v49 = vadd.f32 %v264_v48, %v261_v47 }
  0x63   : > { %v267_v50 = vmax.f32 %v266_v49, 1e-24 }
  0x65   : > { %557 = vrsqrt.f32 %v267_v50  ;;  %vm274_vm3 = vweird.f32 %v267_v50 }
  0x66   : > { %559 = vtanh.f32 %v191_v19 }
  0x67   : > { %561 = vtanh.f32 %v797_v5 }
  0x68   : > { %563 = vtanh.f32 %v193_v22 }
  0x69   : > { %565 = vtanh.f32 %v192_v26 }
  0x6b   : > { %v558_v51 = vpop.eup %557 }
  0x6c   : > { %v269_v52 = vmul.f32 %v558_v51, %v267_v50  ;;  %vm275_vm4 = vweird.f32 %v558_v51  ;;  %v560_v21 = vpop.eup %559 }
  0x6d   : > { %vm276_vm5 = vmor %vm274_vm3, %vm275_vm4 }
  0x6e   : > { %v270_v53 = vmul.f32 %v558_v51, %v269_v52 }
  0x70   : > { %v271_v54 = vmul.f32 0.5, %v270_v53 }
  0x72   : > { %v272_v55 = vsub.f32 1.5, %v271_v54 }
  0x74   : > { %v273_v56 = vmul.f32 %v558_v51, %v272_v55 }
  0x76   : > { %v277_v57 = vsel %vm276_vm5, %v558_v51, %v273_v56 }
  0x77   : > { %v278_v58 = vmul.f32 %v277_v57, %v239_v41  ;;  %v280_v59 = vrot.slane %v277_v57, 7  ;;  %v283_v60 = vrot.slane %v277_v57, 6 }
  0x79   : > { %v282_v61 = vmul.f32 %v280_v59, %v247_v39  ;;  %v285_v62 = vmul.f32 %v283_v60, %v255_v42  ;;  %v299_v63 = vrot.slane %v278_v58, 1  ;;  %v312_v0 = vrot.slane %v278_v58, 2  ;;  %322 = vst [vmem:[%s806_s19] sm:$0x8] %v278_v58 }
  0x7b   : > { %v287_v1 = vrot.slane %v285_v62, 4  ;;  %v291_v2 = vrot.slane %v282_v61, 2  ;;  %v302_v3 = vrot.slane %v285_v62, 5  ;;  %323 = vst [vmem:[%s806_s19] sm:$0x10] %v282_v61  ;;  %v309_v4 = vrot.slane %v282_v61, 4 }
  0x7c   : > { %v314_v6 = vmul.f32 %v312_v0, %v217_v20  ;;  %324 = vst [vmem:[%s806_s19] sm:$0x20] %v285_v62  ;;  %v301_v9 = vmul.f32 %v299_v63, %v220_v24 }
  0x7d   : > { %v289_v7 = vmul.f32 %v287_v1, %v217_v20  ;;  %v293_v8 = vmul.f32 %v291_v2, %v220_v24  ;;  %v304_v10 = vmul.f32 %v302_v3, %v213_v23  ;;  %v311_v11 = vmul.f32 %v309_v4, %v213_v23  ;;  %v562_v23 = vpop.eup %561 }
  0x7e   : > { %v316_v12 = vrot.slane %v314_v6, 1  ;;  %v564_v32 = vpop.eup %563 }
  0x7f   : > { %v295_v13 = vrot.slane %v293_v8, 1  ;;  %v306_v14 = vrot.slane %v304_v10, 6  ;;  %v566_v35 = vpop.eup %565 }
  0x80   : > { %v318_v15 = vsub.f32 %v311_v11, %v316_v12 }
  0x81   : > { %v297_v16 = vsub.f32 %v289_v7, %v295_v13  ;;  %v308_v17 = vsub.f32 %v301_v9, %v306_v14 }
  0x82   : > { %327 = vst [vmem:[%s806_s19 + $0x8] sm:$0x1] %v318_v15 }
  0x83   : > { %325 = vst [vmem:[%s806_s19 + $0x5] sm:$0x2] %v297_v16 }
  0x84   : > { %326 = vst [vmem:[%s806_s19 + $0x5] sm:$0x4] %v308_v17 }
  0x87   : > { %v383_v18 = vpop.permute.xlu2 %382 }
  0x88   : > { %v385_v38 = vrot.slane %v383_v18, 2 }
  0x8f   : > { %v343_v20 = vpop.permute.xlu2 %342 }
  0x90   : > { %v344_v28 = vrot.slane %v343_v20, 2 }
  0x9e   : > { %v363_v24 = vpop.permute.xlu0 %362 }
  0x9f   : > { %v336_v25 = vpop.permute.xlu1 %335  ;;  %v369_v33 = vrot.slane %v363_v24, 2 }
  0xa0   : > { %v337_v27 = vrot.slane %v336_v25, 2 }
  0xa1   : > { %v375_v42 = vmul.f32 %v560_v21, %v369_v33 }
  0xa2   : > { %v339_v29 = vmul.f32 %v562_v23, %v337_v27  ;;  %v340_v30 = vmul.f32 %v560_v21, %v337_v27 }
  0xa4   : > { %v346_v31 = vadd.f32 %v344_v28, %v339_v29  ;;  %v347_v5 = vadd.f32 %v344_v28, %v340_v30 }
  0xa6   : > { %348 = vst [vmem:[%s806_s19 + $0x3] sm:$0xc0] %v346_v31  ;;  %v367_v34 = vpop.permute.xlu0 %366 }
  0xa7   : > { %349 = vst [vmem:[%s806_s19 + $0xb] sm:$0x3f] %v347_v5  ;;  %v370_v36 = vrot.slane %v367_v34, 2 }
  0xa8   : > { %350 = vst [vmem:[%s806_s19 + $0xb] sm:$0xc0] %v346_v31  ;;  %v380_v37 = vpop.permute.xlu1 %379 }
  0xa9   : > { %351 = vst [vmem:[%s806_s19 + $0x13] sm:$0x3f] %v347_v5  ;;  %v384_v39 = vrot.slane %v380_v37, 2  ;;  %v371_v40 = vsel %vm368_vm6, %v369_v33, %v370_v36  ;;  %v377_v41 = vmul.f32 %v564_v32, %v370_v36 }
  0xaa   : > { %352 = vst [vmem:[%s806_s19 + $0x13] sm:$0xc0] %v346_v31  ;;  %v376_v43 = vmul.f32 %v566_v35, %v371_v40 }
  0xab   : > { %353 = vst [vmem:[%s806_s19 + $0x1b] sm:$0x3f] %v347_v5  ;;  %v386_v44 = vsel %vm368_vm6, %v384_v39, %v385_v38  ;;  %v392_v45 = vadd.f32 %v385_v38, %v377_v41  ;;  %v390_v46 = vadd.f32 %v384_v39, %v375_v42 }
  0xac   : > { %354 = vst [vmem:[%s806_s19 + $0x1b] sm:$0xc0] %v346_v31  ;;  %v391_v47 = vadd.f32 %v386_v44, %v376_v43 }
  0xad   : > { %355 = vst [vmem:[%s806_s19 + $0x23] sm:$0x3f] %v347_v5 }
  0xae   : > { %356 = vst [vmem:[%s806_s19 + $0x23] sm:$0xc0] %v346_v31 }
  0xaf   : > { %357 = vst [vmem:[%s806_s19 + $0x2b] sm:$0x3] %v347_v5 }
  0xb0   : > { %395 = vst [vmem:[%s806_s19 + $0x37] sm:$0x3f] %v392_v45 }
  0xb1   : > { %393 = vst [vmem:[%s806_s19 + $0x27] sm:$0xc0] %v390_v46 }
  0xb2   : > { %394 = vst [vmem:[%s806_s19 + $0x2f] sm:$0xff] %v391_v47 }
  0xb3   : > { %624 = shalt.err (!%p621_p7)
}
  0xb4   : > { %s670_s30 = smov 128   ;;  %s671_s11 = smov 256  }
  0xb5   : > { %s672_s17 = smov 8  }
  0xb6   : > { %498 = dma.vmem_to_hbm [thread:$0]  (%p743_p11), %s409_s26, 1024, %s411_s28, %s397_s29, %s670_s30, %s671_s11, %s672_s17  }
  0xb7 PF: > { %s425_s23 = sand.u32 1, %s651_s12   ;;  %p505_p8 = pnand %p486_p9, %p747_p12 }
  0xb8   : > { %s426_s19 = scalar_lea.sflag [#allocation4], %s425_s23 }
  0xb9   : > { %p506_p10 = pneg %p505_p8 }
  0xbb   : > { %646 = dma.done.wait (%p506_p10), %s426_s19, 1024  }
  0xbc   : > { %648 = vsyncadd (%p506_p10), %s426_s19, 4294966272  ;;  %p16_p1 = scmp.ge.s32.totalorder %s718_s18, 4   ;;  %s882_s12 = smov %s655_s13 }
  0xbd   : > { %s883_s13 = smov %s659_s14  ;;  %s884_s14 = smov %s730_s21 }
  0xbe   : > { %s885_s15 = smov %s718_s18  ;;  %18 = sbr.rel (!%p16_p1) target bundleno = 5 (0x5), region = 77 }
  0xc3   :  { %432 = vsyncpa [#allocation3], 1 }
  0xc4   :  { %434 = vsyncpa [#allocation3 + $0x1], 1 }
  0xc5   :  { %435 = vsyncpa [#allocation4], 1 }
  0xc6   :  { %437 = vsyncpa [#allocation4 + $0x1], 1 }

</bundles_post_ra>
